<compile_context>
chip_gen: v5e
topology: v5e:2x2
jax: 0.10.0
libtpu: 0.0.40
codegen_flags: <defaults>
</compile_context>

<pallas_src>
import jax
import jax.numpy as jnp
from jax.experimental import pallas as pl
from jax.experimental.pallas import tpu as pltpu


def _round_up(x, m):
    return ((x + m - 1) // m) * m


def _pick_spatial_tile(hw2, max_tile=1024):
    # Largest divisor of the pooled-spatial extent that is a multiple of 8
    # (sublane granularity) and <= max_tile; fall back to the full extent
    # (block == full dim is always legal).
    best = None
    for t in range(8, min(hw2, max_tile) + 1, 8):
        if hw2 % t == 0:
            best = t
    return best if best is not None else hw2


def transition_kernel(x_ref, scale_ref, bias_ref, w_ref, o_ref):
    # x_ref:     (1, 2, 2, TS, Cp)  f32  pooling partners split on axes 1, 2
    # scale_ref: (1, Cp)            f32  folded BN scale  (gamma / sqrt(var+eps))
    # bias_ref:  (1, Cp)            f32  folded BN bias   (beta - mean*scale)
    # w_ref:     (Cp, Coutp)        bf16 1x1 conv weight (transposed, padded)
    # o_ref:     (1, TS, Coutp)     f32
    x = x_ref[0]                                                    # (2,2,TS,Cp)
    y = jnp.maximum(x * scale_ref[...] + bias_ref[...], 0.0)        # BN + ReLU (f32, VPU)
    # 2x2 average pool on the VPU (pool-before-conv: exact, since both linear).
    p = 0.25 * (y[0, 0] + y[0, 1] + y[1, 0] + y[1, 1])              # (TS, Cp)
    # 1x1 conv as a bf16 MXU matmul with f32 accumulation.
    z = jnp.dot(p.astype(jnp.bfloat16), w_ref[...],
                preferred_element_type=jnp.float32)                 # (TS, Coutp)
    o_ref[0] = z.astype(o_ref.dtype)


def transition_forward(x_nchw, gamma, beta, conv_w, eps=1e-5, max_spatial_tile=1024):
    N, C, H, W = x_nchw.shape
    Cout = conv_w.shape[0]
    assert H % 2 == 0 and W % 2 == 0, "2x2/stride-2 avg-pool needs even H, W"
    Hh, Wh = H // 2, W // 2
    HW2 = Hh * Wh

    Cp = _round_up(C, 128)        # lane-dense / MXU-friendly contraction dim
    Coutp = _round_up(Cout, 128)  # lane-dense output dim (unmasked stores)

    # --- glue: NCHW -> (N, 2, 2, Hh*Wh, C): channels-last, each of the four
    # 2x2-pool partners on its own leading slice (so the kernel pools with
    # plain indexing, no strided access, no pool matmul).
    x_nhwc = jnp.transpose(x_nchw, (0, 2, 3, 1))                     # (N,H,W,C)
    x_r = x_nhwc.reshape(N, Hh, 2, Wh, 2, C)
    x_r = jnp.transpose(x_r, (0, 2, 4, 1, 3, 5)).reshape(N, 2, 2, HW2, C)
    x_r = x_r.astype(jnp.float32)

    # --- glue: training-mode BatchNorm2d stats from the rearranged copy
    # (single full-size pass), folded to per-channel scale/bias.
    mean = jnp.mean(x_r, axis=(0, 1, 2, 3))
    var = jnp.var(x_r, axis=(0, 1, 2, 3))          # biased variance (PyTorch fwd)
    scale = gamma.astype(jnp.float32) / jnp.sqrt(var + eps)          # (C,)
    bias = beta.astype(jnp.float32) - mean * scale                   # (C,)

    # --- pad channels to multiples of 128 (pad channels have scale=bias=0 and
    # zero weight rows, so they contribute nothing).
    x_p = jnp.pad(x_r, ((0, 0), (0, 0), (0, 0), (0, 0), (0, Cp - C)))
    scale_p = jnp.pad(scale, (0, Cp - C)).reshape(1, Cp)
    bias_p = jnp.pad(bias, (0, Cp - C)).reshape(1, Cp)
    w = conv_w.reshape(Cout, C).T.astype(jnp.bfloat16)               # (C, Cout)
    w_p = jnp.pad(w, ((0, Cp - C), (0, Coutp - Cout)))               # (Cp, Coutp)

    # --- spatial tiling over the pooled spatial dim.
    TS = _pick_spatial_tile(HW2, max_spatial_tile)
    n_sp = HW2 // TS if HW2 % TS == 0 else 1
    if HW2 % TS != 0:
        TS = HW2

    # NOTE: scale/bias/w index_maps are grid-invariant; their double-buffering
    # overhead is negligible at these operand sizes, so default pipelining kept.
    out_flat = pl.pallas_call(
        transition_kernel,
        out_shape=jax.ShapeDtypeStruct((N, HW2, Coutp), jnp.float32),
        grid_spec=pltpu.PrefetchScalarGridSpec(
            num_scalar_prefetch=0,
            grid=(N, n_sp),
            in_specs=[
                pl.BlockSpec((1, 2, 2, TS, Cp), lambda n, s: (n, 0, 0, s, 0)),
                pl.BlockSpec((1, Cp), lambda n, s: (0, 0)),
                pl.BlockSpec((1, Cp), lambda n, s: (0, 0)),
                pl.BlockSpec((Cp, Coutp), lambda n, s: (0, 0)),
            ],
            out_specs=pl.BlockSpec((1, TS, Coutp), lambda n, s: (n, s, 0)),
        ),
        compiler_params=pltpu.CompilerParams(
            dimension_semantics=("parallel", "parallel"),
            vmem_limit_bytes=48 * 1024 * 1024,
        ),
    )(x_p, scale_p, bias_p, w_p)

    # drop channel padding; back to NCHW: (N, Cout, H/2, W/2)
    out = out_flat[:, :, :Cout]
    return out.reshape(N, Hh, Wh, Cout).transpose(0, 3, 1, 2)


def transition_reference(x, gamma, beta, conv_w, eps=1e-5):
    mean = jnp.mean(x, axis=(0, 2, 3), keepdims=True)
    var = jnp.var(x, axis=(0, 2, 3), keepdims=True)
    xn = (x - mean) / jnp.sqrt(var + eps)
    xn = xn * gamma.reshape(1, -1, 1, 1) + beta.reshape(1, -1, 1, 1)
    y = jnp.maximum(xn, 0.0)
    z = jnp.einsum('oc,nchw->nohw', conv_w.reshape(conv_w.shape[0], -1), y)
    N, Co, H, W = z.shape
    return z.reshape(N, Co, H // 2, 2, W // 2, 2).mean(axis=(3, 5))


if __name__ == "__main__":
    # Small shapes consistent with Transition(nChannels=4, nOutChannels=8).
    N, C, H, W = 2, 4, 16, 16
    Cout = 8

    key = jax.random.PRNGKey(0)
    kx, kw, kg, kb = jax.random.split(key, 4)

    x = jax.random.normal(kx, (N, C, H, W), dtype=jnp.float32)
    # Deterministic synthetic parameters (not a checkpoint load).
    conv_w = jax.random.normal(kw, (Cout, C, 1, 1), dtype=jnp.float32) * 0.1
    gamma = 1.0 + 0.1 * jax.random.normal(kg, (C,), dtype=jnp.float32)
    beta = 0.1 * jax.random.normal(kb, (C,), dtype=jnp.float32)

    out = transition_forward(x, gamma, beta, conv_w)
    out = jax.block_until_ready(out)

    ref = transition_reference(x, gamma, beta, conv_w)
    assert out.shape == (N, Cout, H // 2, W // 2), out.shape
    # bf16 matmul operands -> loosened tolerance (f32 accumulation keeps it tight).
    assert jnp.allclose(out, ref, atol=1e-2, rtol=1e-2), float(jnp.max(jnp.abs(out - ref)))

    print("KERNEL_OK")
</pallas_src>

<mosaic_0001>
module attributes {stable_mosaic.version = 11 : i64} {
  func.func @transition_kernel(%arg0: i32, %arg1: i32, %arg2: memref<1x2x2x64x128xf32, #tpu.memory_space<vmem>>, %arg3: memref<1x128xf32, #tpu.memory_space<vmem>>, %arg4: memref<1x128xf32, #tpu.memory_space<vmem>>, %arg5: memref<128x128xbf16, #tpu.memory_space<vmem>>, %arg6: memref<1x64x128xf32, #tpu.memory_space<vmem>>) attributes {dimension_semantics = [#tpu.dimension_semantics<parallel>, #tpu.dimension_semantics<parallel>], iteration_bounds = array<i64: 2, 1>, scalar_prefetch = 0 : i64, scratch_operands = 0 : i64, tpu.core_type = #tpu.core_type<tc>, window_params = [{transform_indices = @transform_0, window_bounds = array<i64: 1, 2, 2, 64, 128>}, {pipeline_mode = #tpu.pipeline_mode<synchronous>, transform_indices = @transform_1, window_bounds = array<i64: 1, 128>}, {pipeline_mode = #tpu.pipeline_mode<synchronous>, transform_indices = @transform_2, window_bounds = array<i64: 1, 128>}, {pipeline_mode = #tpu.pipeline_mode<synchronous>, transform_indices = @transform_3, window_bounds = array<i64: 128, 128>}, {transform_indices = @transform_4, window_bounds = array<i64: 1, 64, 128>}]} {
    %c0 = arith.constant 0 : index
    %c0_0 = arith.constant 0 : index
    %c0_1 = arith.constant 0 : index
    %c0_2 = arith.constant 0 : index
    %c0_3 = arith.constant 0 : index
    %0 = vector.load %arg2[%c0, %c0_0, %c0_1, %c0_2, %c0_3] : memref<1x2x2x64x128xf32, #tpu.memory_space<vmem>>, vector<1x2x2x64x128xf32>
    %1 = vector.shape_cast %0 : vector<1x2x2x64x128xf32> to vector<2x2x64x128xf32>
    %c0_4 = arith.constant 0 : index
    %c0_5 = arith.constant 0 : index
    %2 = vector.load %arg3[%c0_4, %c0_5] : memref<1x128xf32, #tpu.memory_space<vmem>>, vector<1x128xf32>
    %3 = vector.shape_cast %2 : vector<1x128xf32> to vector<1x1x1x128xf32>
    %4 = vector.broadcast %3 : vector<1x1x1x128xf32> to vector<2x2x64x128xf32>
    %5 = arith.mulf %1, %4 : vector<2x2x64x128xf32>
    %c0_6 = arith.constant 0 : index
    %c0_7 = arith.constant 0 : index
    %6 = vector.load %arg4[%c0_6, %c0_7] : memref<1x128xf32, #tpu.memory_space<vmem>>, vector<1x128xf32>
    %7 = vector.shape_cast %6 : vector<1x128xf32> to vector<1x1x1x128xf32>
    %8 = vector.broadcast %7 : vector<1x1x1x128xf32> to vector<2x2x64x128xf32>
    %9 = arith.addf %5, %8 : vector<2x2x64x128xf32>
    %cst = arith.constant 0.000000e+00 : f32
    %10 = vector.broadcast %cst : f32 to vector<2x2x64x128xf32>
    %11 = arith.maximumf %9, %10 : vector<2x2x64x128xf32>
    %12 = vector.extract_strided_slice %11 {offsets = [0, 0, 0, 0], sizes = [1, 1, 64, 128], strides = [1, 1, 1, 1]} : vector<2x2x64x128xf32> to vector<1x1x64x128xf32>
    %13 = vector.shape_cast %12 : vector<1x1x64x128xf32> to vector<64x128xf32>
    %14 = vector.extract_strided_slice %11 {offsets = [0, 1, 0, 0], sizes = [1, 1, 64, 128], strides = [1, 1, 1, 1]} : vector<2x2x64x128xf32> to vector<1x1x64x128xf32>
    %15 = vector.shape_cast %14 : vector<1x1x64x128xf32> to vector<64x128xf32>
    %16 = arith.addf %13, %15 : vector<64x128xf32>
    %17 = vector.extract_strided_slice %11 {offsets = [1, 0, 0, 0], sizes = [1, 1, 64, 128], strides = [1, 1, 1, 1]} : vector<2x2x64x128xf32> to vector<1x1x64x128xf32>
    %18 = vector.shape_cast %17 : vector<1x1x64x128xf32> to vector<64x128xf32>
    %19 = arith.addf %16, %18 : vector<64x128xf32>
    %20 = vector.extract_strided_slice %11 {offsets = [1, 1, 0, 0], sizes = [1, 1, 64, 128], strides = [1, 1, 1, 1]} : vector<2x2x64x128xf32> to vector<1x1x64x128xf32>
    %21 = vector.shape_cast %20 : vector<1x1x64x128xf32> to vector<64x128xf32>
    %22 = arith.addf %19, %21 : vector<64x128xf32>
    %cst_8 = arith.constant 2.500000e-01 : f32
    %23 = vector.broadcast %cst_8 : f32 to vector<64x128xf32>
    %24 = arith.mulf %23, %22 : vector<64x128xf32>
    %25 = arith.truncf %24 : vector<64x128xf32> to vector<64x128xbf16>
    %c0_9 = arith.constant 0 : index
    %c0_10 = arith.constant 0 : index
    %26 = vector.load %arg5[%c0_9, %c0_10] : memref<128x128xbf16, #tpu.memory_space<vmem>>, vector<128x128xbf16>
    %cst_11 = arith.constant dense<0.000000e+00> : vector<64x128xf32>
    %27 = tpu.matmul %25, %26, %cst_11 {dimension_numbers = #tpu.dot_dimension_numbers<[1], [0], [0], [1], [0, 0, 1, 1], [], []>} : vector<64x128xbf16>, vector<128x128xbf16>, vector<64x128xf32> -> vector<64x128xf32>
    %c0_12 = arith.constant 0 : index
    %c0_13 = arith.constant 0 : index
    %c0_14 = arith.constant 0 : index
    %28 = vector.load %arg6[%c0_12, %c0_13, %c0_14] : memref<1x64x128xf32, #tpu.memory_space<vmem>>, vector<1x64x128xf32>
    %29 = vector.shape_cast %28 : vector<1x64x128xf32> to vector<64x128xf32>
    %30 = vector.shape_cast %27 : vector<64x128xf32> to vector<1x64x128xf32>
    tpu.vector_store %arg6[%c0_12, %c0_13, %c0_14], %30 {strides = array<i32>} : memref<1x64x128xf32, #tpu.memory_space<vmem>>, vector<1x64x128xf32>,
    return
  }
  func.func @transform_0(%arg0: i32, %arg1: i32) -> (i32, i32, i32, i32, i32) {
    %c0_i32 = arith.constant 0 : i32
    %c0_i32_0 = arith.constant 0 : i32
    %c0_i32_1 = arith.constant 0 : i32
    %c0_i32_2 = arith.constant 0 : i32
    return %arg0, %c0_i32, %c0_i32_0, %arg1, %c0_i32_1 : i32, i32, i32, i32, i32
  }
  func.func @transform_1(%arg0: i32, %arg1: i32) -> (i32, i32) {
    %c0_i32 = arith.constant 0 : i32
    %c0_i32_0 = arith.constant 0 : i32
    %c0_i32_1 = arith.constant 0 : i32
    return %c0_i32, %c0_i32_0 : i32, i32
  }
  func.func @transform_2(%arg0: i32, %arg1: i32) -> (i32, i32) {
    %c0_i32 = arith.constant 0 : i32
    %c0_i32_0 = arith.constant 0 : i32
    %c0_i32_1 = arith.constant 0 : i32
    return %c0_i32, %c0_i32_0 : i32, i32
  }
  func.func @transform_3(%arg0: i32, %arg1: i32) -> (i32, i32) {
    %c0_i32 = arith.constant 0 : i32
    %c0_i32_0 = arith.constant 0 : i32
    %c0_i32_1 = arith.constant 0 : i32
    return %c0_i32, %c0_i32_0 : i32, i32
  }
  func.func @transform_4(%arg0: i32, %arg1: i32) -> (i32, i32, i32) {
    %c0_i32 = arith.constant 0 : i32
    %c0_i32_0 = arith.constant 0 : i32
    return %arg0, %arg1, %c0_i32 : i32, i32, i32
  }
}

</mosaic_0001>

<bundles_post_ra>
// kernel: tpu_custom_call.1
= control target key start
LH: loop header
LB: loop body
LE: loop exit
PB: predicated region body
PF: predicated region fallthrough
CT: control target
= control target key end

     0   :  { %s1322_s0 = inlined_call_operand.hbm [shape: f32[2,2,2,64,128], index: 0, kind: input, shape index: {}]   ;;  %s1323_s1 = inlined_call_operand.hbm [shape: f32[1,128], index: 1, kind: input, shape index: {}]   ;;  %s1324_s2 = inlined_call_operand.vmem [shape: f32[1,128], index: 2, kind: input, shape index: {}]   ;;  %s1325_s3 = inlined_call_operand.hbm [shape: bf16[128,128], index: 3, kind: input, shape index: {}]   ;;  %s1326_s4 = inlined_call_operand.hbm [shape: f32[2,64,128], index: 4, kind: output, shape index: {}]  }
   0x1   :  { %1327 = sst [smem:[#allocation12_spill]] %s1323_s1 }
   0x2   :  { %1328 = sst [smem:[#allocation13_spill]] %s1325_s3 }
   0x3   :  { %9 = vsyncpa [#allocation3], 0 }
   0x4   :  { %11 = vsyncpa [#allocation3 + $0x1], 0 }
   0x5   :  { %12 = vsyncpa [#allocation6], 0 }
   0x6   :  { %13 = vsyncpa [#allocation4], 0 }
   0x7   :  { %15 = vsyncpa [#allocation4 + $0x1], 0  ;;  %s1053_s15 = smov 0   ;;  %s1055_s16 = smov 0  }
   0x8   :  { %s1057_s17 = smov 0   ;;  %s1059_s18 = smov 0  }
   0x9   :  { %s1061_s19 = smov 0   ;;  %s1063_s20 = smov 0  }
   0xa LB: > { %s666_s21 = sadd.s32 4294967295, %s1018_s20   ;;  %s667_s22 = sadd.s32 4294967294, %s1018_s20   ;;  %s1018_s20 = sphi %s1063_s20, %s21_s20   ;;  %s1014_s19 = sphi %s1061_s19, %s1343_s19   ;;  %s1010_s18 = sphi %s1059_s18, %s1342_s18   ;;  %s1006_s17 = sphi %s1057_s17, %s1341_s17   ;;  %s1002_s16 = sphi %s1055_s16, %s1340_s16   ;;  %s998_s15 = sphi %s1053_s15, %s1339_s15  }
   0xb   : > { %p49_p0 = scmp.ne.s32.totalorder %s1006_s17, %s1002_s16  ;;  %p50_p1 = scmp.eq.s32.totalorder %s1018_s20, 0 }
   0xc   : > { %p55_p2 = scmp.ne.s32.totalorder %s1002_s16, %s998_s15  ;;  %p1091_p3 = scmp.eq.s32.totalorder %s666_s21, 0 }
   0xd   : > { %p144_p4 = scmp.eq.s32.totalorder %s666_s21, 1  ;;  %p1095_p5 = por %p50_p1, %p49_p0 }
   0xe   : > { %p150_p6 = scmp.eq.s32.totalorder %s667_s22, 1  ;;  %p1101_p7 = por %p1091_p3, %p55_p2 }
   0xf   : > { %p1105_p8 = por %p144_p4, %p49_p0  ;;  %p668_p10 = scmp.ge.s32.totalorder %s1018_s20, 1 }
  0x10   : > { %p1109_p9 = por %p150_p6, %p55_p2  ;;  %p157_p11 = scmp.lt.s32.totalorder %s1018_s20, 3 }
  0x11   : > { %s1334_s1 = sld [smem:[#allocation12_spill]]  ;;  %s1020_s7 = smov [#allocation5]  }
  0x12   : > { %p1118_p12 = pnand %p668_p10, %p157_p11  ;;  %s171_s8 = sshll.u32 %s1020_s7, 4  ;;  %s172_s8 = int_to_ptr.vmem [resolvable:$true] %s171_s8 }
  0x13   : > { %p671_p13 = scmp.ge.s32.totalorder %s1018_s20, 2  ;;  %p780_p1 = scmp.lt.s32.totalorder %s1018_s20, 2 }
  0x14   : > { %p763_p0 = pneg %p1118_p12  ;;  %s1336_s3 = sld [smem:[#allocation13_spill]] }
  0x15   : > { %p1133_p4 = pnand %p780_p1, %p1095_p5  ;;  %s1021_s13 = smov [#allocation7]  }
  0x16   : > { %p764_p2 = pnand %p763_p0, %p1091_p3  ;;  %s185_s14 = sshll.u32 %s1021_s13, 4  ;;  %s186_s14 = int_to_ptr.vmem [resolvable:$true] %s185_s14 }
  0x17   : > { %s169_s5 = sshll.u32 %s1334_s1, 4  ;;  %s1022_s21 = smov 64   ;;  %s170_s5 = int_to_ptr.hbm [resolvable:$true] %s169_s5 }
  0x18   : > { %766 = dma.hbm_to_vmem [thread:$0]  (!%p764_p2), %s170_s5, 16, %s172_s8, [#allocation6]  }
  0x19   : > { %s1023_s22 = smov 4   ;;  %s199_s29 = sand.u32 1, %s1006_s17  }
  0x1a   : > { %s183_s11 = sshll.u32 %s1336_s3, 4  ;;  %s33_s30 = sadd.s32 1, %s1014_s19  ;;  %s184_s11 = int_to_ptr.hbm [resolvable:$true] %s183_s11 }
  0x1b   : > { %769 = dma.hbm_to_vmem [thread:$0]  (!%p764_p2), %s184_s11, 1024, %s186_s14, [#allocation6], %s1022_s21, %s1022_s21, %s1023_s22  }
  0x1c   : > { %s672_s7 = sshll.u32 %s199_s29, 8  ;;  %p35_p6 = scmp.ge.s32.totalorder %s33_s30, 2 }
  0x1d   : > { %s717_s25 = sshll.u32 %s1014_s19, 8  ;;  %s203_s9 = scalar_lea.vmem [#allocation2], %s672_s7 }
  0x1e   : > { %s213_s10 = sshll.u32 %s203_s9, 4  ;;  %s1345_s30 = smov (%p35_p6, %s33_s30), 0  ;;  %s214_s10 = int_to_ptr.vmem [resolvable:$true] %s213_s10 }
  0x1f   : > { %s210_s5 = scalar_lea.hbm %s1322_s0, %s717_s25  ;;  %s37_s8 = ssub.s32 %s1014_s19, %s1345_s30 }
  0x20   : > { %s211_s1 = sshll.u32 %s210_s5, 4  ;;  %p40_p5 = scmp.eq.s32.totalorder %s37_s8, 0  ;;  %s212_s1 = int_to_ptr.hbm [resolvable:$true] %s211_s1 }
  0x21   : > { %s1338_s11 = sadd.s32 1, %s1006_s17  ;;  %s200_s21 = scalar_lea.sflag [#allocation3], %s199_s29 }
  0x22   : > { %s1150_s14 = scalar_select %p40_p5, %s1006_s17, %s1338_s11  }
  0x23   : > { %s1024_s22 = smov 128   ;;  %s1025_s3 = smov 8  }
  0x24   : > { %773 = dma.hbm_to_vmem [thread:$0]  (!%p1133_p4), %s212_s1, 4096, %s214_s10, %s200_s21, %s1024_s22, %s1024_s22, %s1025_s3  }
  0x25   : > { %225 = sbr.rel (%p1118_p12) target bundleno = 238 (0xee), region = 36  ;;  %s1157_s23 = sand.u32 (!%p1118_p12), 1, %s1002_s16  }
  0x26   : > { %s676_s7 = sshll.u32 (!%p1118_p12), %s1157_s23, 8  ;;  %s228_s25 = scalar_lea.sflag (!%p1118_p12), [#allocation3], %s1157_s23 }
  0x27   : > { %s1161_s9 = scalar_lea.vmem (!%p1118_p12), [#allocation2], %s676_s7 }
  0x2a   : > { %985 = dma.done.wait (%p1101_p7), %s228_s25, 4096  }
  0x2b   : > { %987 = vsyncadd (%p1101_p7), %s228_s25, 4294963200 }
  0x2c   : > { %989 = dma.done.wait (%p1091_p3), [#allocation6], 1040  }
  0x2d   : > { %991 = vsyncadd (%p1091_p3), [#allocation6], 4294966256  ;;  %v725_v0 = vld [vmem:[#allocation7 + $0x38] sm:$0xff]  ;;  %v724_v1 = vld [vmem:[#allocation7 + $0x30] sm:$0xff]  ;;  %s679_s24 = sshll.u32 %s1157_s23, 6  ;;  %s726_s6 = sshll.u32 %s1010_s18, 6 }
  0x2e   : > { %505 = vmatpush.bf16.msra.mxu0 %v725_v0  ;;  %727 = vmatpush.bf16.msra.mxu1 %v725_v0  ;;  %v269_v2 = vld [vmem:[%s1161_s9] sm:$0xff]  ;;  %v270_v3 = vld [vmem:[%s1161_s9 + $0x8] sm:$0xff]  ;;  %v271_v28 = vld [vmem:[%s1161_s9 + $0x10] sm:$0xff]  ;;  %s266_s26 = scalar_lea.vmem [#allocation8], %s679_s24  ;;  %s556_s10 = scalar_lea.hbm %s1326_s4, %s726_s6 }
  0x2f   : > { %728 = vmatpush.bf16.msra.mxu2 %v725_v0  ;;  %729 = vmatpush.bf16.msra.mxu3 %v725_v0  ;;  %v277_v4 = vld [vmem:[%s1161_s9 + $0x40] sm:$0xff]  ;;  %v723_v5 = vld [vmem:[#allocation7 + $0x28] sm:$0xff]  ;;  %v272_v29 = vld [vmem:[%s1161_s9 + $0x18] sm:$0xff]  ;;  %s557_s13 = sshll.u32 %s266_s26, 4  ;;  %s559_s5 = sshll.u32 %s556_s10, 4  ;;  %s558_s13 = int_to_ptr.vmem [resolvable:$true] %s557_s13  ;;  %s560_s5 = int_to_ptr.hbm [resolvable:$true] %s559_s5 }
  0x30   : > { %v278_v6 = vld [vmem:[%s1161_s9 + $0x48] sm:$0xff]  ;;  %v285_v7 = vld [vmem:[%s1161_s9 + $0x80] sm:$0xff]  ;;  %v279_v34 = vld [vmem:[%s1161_s9 + $0x50] sm:$0xff]  ;;  %s543_s8 = scalar_lea.sflag [#allocation4], %s1157_s23  ;;  %s946_s11 = sshra.s32 %s560_s5, 4  ;;  %s947_s11 = int_to_ptr.hbm [resolvable:$true] %s946_s11 }
  0x31   : > { %v286_v8 = vld [vmem:[%s1161_s9 + $0x88] sm:$0xff]  ;;  %v293_v9 = vld [vmem:[%s1161_s9 + $0xc0] sm:$0xff]  ;;  %v280_v35 = vld [vmem:[%s1161_s9 + $0x58] sm:$0xff]  ;;  %s948_s21 = scalar_lea.hbm %s947_s11, 64  ;;  %s952_s7 = scalar_lea.hbm %s1326_s4, 128 }
  0x32   : > { %v1178_v10 = vld [vmem:[#allocation5] ss:$0 sm:$0xff]  ;;  %506 = vmatpush.bf16.msra.mxu0 %v724_v1  ;;  %730 = vmatpush.bf16.msra.mxu1 %v724_v1  ;;  %v294_v11 = vld [vmem:[%s1161_s9 + $0xc8] sm:$0xff]  ;;  %v287_v40 = vld [vmem:[%s1161_s9 + $0x90] sm:$0xff]  ;;  %p949_p3 = scmp.ne.s32.totalorder %s947_s11, %s948_s21  ;;  %p953_p11 = scmp.lt.s32.totalorder %s947_s11, %s1326_s4 }
  0x33   : > { %v1184_v12 = vld [vmem:[%s1324_s2] ss:$0 sm:$0xff]  ;;  %731 = vmatpush.bf16.msra.mxu2 %v724_v1  ;;  %732 = vmatpush.bf16.msra.mxu3 %v724_v1  ;;  %v305_v13 = vmul.f32 %v1178_v10, %v269_v2  ;;  %v306_v14 = vmul.f32 %v1178_v10, %v270_v3  ;;  %v313_v15 = vmul.f32 %v1178_v10, %v277_v4  ;;  %v722_v24 = vld [vmem:[#allocation7 + $0x20] sm:$0xff]  ;;  %v288_v41 = vld [vmem:[%s1161_s9 + $0x98] sm:$0xff]  ;;  %p954_p12 = scmp.lt.s32.totalorder %s952_s7, %s948_s21 }
  0x34   : > { %v314_v16 = vmul.f32 %v1178_v10, %v278_v6  ;;  %v321_v17 = vmul.f32 %v1178_v10, %v285_v7  ;;  %v322_v18 = vmul.f32 %v1178_v10, %v286_v8  ;;  %v329_v19 = vmul.f32 %v1178_v10, %v293_v9  ;;  %v295_v43 = vld [vmem:[%s1161_s9 + $0xd0] sm:$0xff]  ;;  %v296_v44 = vld [vmem:[%s1161_s9 + $0xd8] sm:$0xff]  ;;  %v273_v7 = vld [vmem:[%s1161_s9 + $0x20] sm:$0xff]  ;;  %p950_p7 = pnand %p949_p3, %p1105_p8 }
  0x35   : > { %v330_v20 = vmul.f32 %v1178_v10, %v294_v11  ;;  %v341_v21 = vadd.f32 %v1184_v12, %v305_v13  ;;  %v342_v22 = vadd.f32 %v1184_v12, %v306_v14  ;;  %v349_v23 = vadd.f32 %v1184_v12, %v313_v15  ;;  %v721_v47 = vld [vmem:[#allocation7 + $0x18] sm:$0xff]  ;;  %v720_v63 = vld [vmem:[#allocation7 + $0x10] sm:$0xff]  ;;  %v274_v14 = vld [vmem:[%s1161_s9 + $0x28] sm:$0xff]  ;;  %p955_p0 = por %p954_p12, %p953_p11 }
  0x36   : > { %507 = vmatpush.bf16.msra.mxu0 %v723_v5  ;;  %733 = vmatpush.bf16.msra.mxu1 %v723_v5  ;;  %v350_v25 = vadd.f32 %v1184_v12, %v314_v16  ;;  %v357_v26 = vadd.f32 %v1184_v12, %v321_v17  ;;  %v358_v27 = vadd.f32 %v1184_v12, %v322_v18  ;;  %v281_v15 = vld [vmem:[%s1161_s9 + $0x60] sm:$0xff]  ;;  %p951_p10 = pneg %p950_p7 }
  0x37   : > { %734 = vmatpush.bf16.msra.mxu2 %v723_v5  ;;  %735 = vmatpush.bf16.msra.mxu3 %v723_v5  ;;  %v365_v30 = vadd.f32 %v1184_v12, %v329_v19  ;;  %v366_v31 = vadd.f32 %v1184_v12, %v330_v20  ;;  %v373_v32 = vmax.f32 %v341_v21, 0.0  ;;  %v374_v33 = vmax.f32 %v342_v22, 0.0  ;;  %v282_v19 = vld [vmem:[%s1161_s9 + $0x68] sm:$0xff]  ;;  %v289_v20 = vld [vmem:[%s1161_s9 + $0xa0] sm:$0xff] }
  0x38   : > { %v381_v36 = vmax.f32 %v349_v23, 0.0  ;;  %v382_v37 = vmax.f32 %v350_v25, 0.0  ;;  %v389_v38 = vmax.f32 %v357_v26, 0.0  ;;  %v390_v39 = vmax.f32 %v358_v27, 0.0  ;;  %v290_v21 = vld [vmem:[%s1161_s9 + $0xa8] sm:$0xff]  ;;  %v297_v26 = vld [vmem:[%s1161_s9 + $0xe0] sm:$0xff]  ;;  %p956_p1 = pnand %p955_p0, %p951_p10 }
  0x39   : > { %v397_v42 = vmax.f32 %v365_v30, 0.0  ;;  %v307_v45 = vmul.f32 %v1178_v10, %v271_v28  ;;  %v308_v46 = vmul.f32 %v1178_v10, %v272_v29  ;;  %v398_v48 = vmax.f32 %v366_v31, 0.0  ;;  %v719_v22 = vld [vmem:[#allocation7 + $0x8] sm:$0xff] }
  0x3a   : > { %508 = vmatpush.bf16.msra.mxu0 %v722_v24  ;;  %736 = vmatpush.bf16.msra.mxu1 %v722_v24  ;;  %v405_v49 = vadd.f32 %v381_v36, %v373_v32  ;;  %v406_v50 = vadd.f32 %v382_v37, %v374_v33  ;;  %v315_v51 = vmul.f32 %v1178_v10, %v279_v34  ;;  %v298_v27 = vld [vmem:[%s1161_s9 + $0xe8] sm:$0xff] }
  0x3b   : > { %737 = vmatpush.bf16.msra.mxu2 %v722_v24  ;;  %738 = vmatpush.bf16.msra.mxu3 %v722_v24  ;;  %v316_v52 = vmul.f32 %v1178_v10, %v280_v35  ;;  %v323_v53 = vmul.f32 %v1178_v10, %v287_v40  ;;  %v324_v54 = vmul.f32 %v1178_v10, %v288_v41  ;;  %v718_v41 = vld [vmem:[#allocation7] sm:$0xff] }
  0x3c   : > { %v413_v55 = vadd.f32 %v405_v49, %v389_v38  ;;  %v414_v56 = vadd.f32 %v406_v50, %v390_v39  ;;  %v331_v57 = vmul.f32 %v1178_v10, %v295_v43  ;;  %v332_v58 = vmul.f32 %v1178_v10, %v296_v44 }
  0x3d   : > { %v343_v59 = vadd.f32 %v1184_v12, %v307_v45  ;;  %v344_v60 = vadd.f32 %v1184_v12, %v308_v46  ;;  %v351_v61 = vadd.f32 %v1184_v12, %v315_v51  ;;  %v352_v62 = vadd.f32 %v1184_v12, %v316_v52 }
  0x3e   : > { %509 = vmatpush.bf16.msra.mxu0 %v721_v47  ;;  %739 = vmatpush.bf16.msra.mxu1 %v721_v47  ;;  %v421_v0 = vadd.f32 %v413_v55, %v397_v42  ;;  %v422_v1 = vadd.f32 %v414_v56, %v398_v48  ;;  %v359_v2 = vadd.f32 %v1184_v12, %v323_v53  ;;  %v275_v53 = vld [vmem:[%s1161_s9 + $0x30] sm:$0xff] }
  0x3f   : > { %740 = vmatpush.bf16.msra.mxu2 %v721_v47  ;;  %741 = vmatpush.bf16.msra.mxu3 %v721_v47  ;;  %v360_v3 = vadd.f32 %v1184_v12, %v324_v54  ;;  %v367_v4 = vadd.f32 %v1184_v12, %v331_v57  ;;  %v368_v5 = vadd.f32 %v1184_v12, %v332_v58  ;;  %v375_v6 = vmax.f32 %v343_v59, 0.0  ;;  %v276_v54 = vld [vmem:[%s1161_s9 + $0x38] sm:$0xff]  ;;  %v283_v59 = vld [vmem:[%s1161_s9 + $0x70] sm:$0xff] }
  0x40   : > { %v1227_v8 = vmul.f32 0.25, %v421_v0  ;;  %v1229_v9 = vmul.f32 0.25, %v422_v1  ;;  %v376_v11 = vmax.f32 %v344_v60, 0.0  ;;  %v383_v13 = vmax.f32 %v351_v61, 0.0  ;;  %v284_v60 = vld [vmem:[%s1161_s9 + $0x78] sm:$0xff]  ;;  %v291_v0 = vld [vmem:[%s1161_s9 + $0xb0] sm:$0xff] }
  0x41   : > { %v384_v16 = vmax.f32 %v352_v62, 0.0  ;;  %v391_v17 = vmax.f32 %v359_v2, 0.0  ;;  %v392_v18 = vmax.f32 %v360_v3, 0.0  ;;  %v399_v24 = vmax.f32 %v367_v4, 0.0 }
  0x42   : > { %510 = vmatpush.bf16.msra.mxu0 %v720_v63  ;;  %742 = vmatpush.bf16.msra.mxu1 %v720_v63  ;;  %v437_v23 = vpack.c.bf16 %v1229_v9, %v1227_v8  ;;  %v407_v25 = vadd.f32 %v383_v13, %v375_v6  ;;  %v309_v28 = vmul.f32 %v1178_v10, %v273_v7  ;;  %v400_v29 = vmax.f32 %v368_v5, 0.0  ;;  %v292_v5 = vld [vmem:[%s1161_s9 + $0xb8] sm:$0xff]  ;;  %v299_v6 = vld [vmem:[%s1161_s9 + $0xf0] sm:$0xff] }
  0x43   : > { %743 = vmatpush.bf16.msra.mxu2 %v720_v63  ;;  %744 = vmatpush.bf16.msra.mxu3 %v720_v63  ;;  %v408_v30 = vadd.f32 %v384_v16, %v376_v11  ;;  %v310_v31 = vmul.f32 %v1178_v10, %v274_v14  ;;  %v317_v32 = vmul.f32 %v1178_v10, %v281_v15  ;;  %v300_v7 = vld [vmem:[%s1161_s9 + $0xf8] sm:$0xff] }
  0x44   : > { %v415_v33 = vadd.f32 %v407_v25, %v391_v17  ;;  %v318_v34 = vmul.f32 %v1178_v10, %v282_v19  ;;  %v325_v35 = vmul.f32 %v1178_v10, %v289_v20  ;;  %v326_v36 = vmul.f32 %v1178_v10, %v290_v21 }
  0x45   : > { %v416_v37 = vadd.f32 %v408_v30, %v392_v18  ;;  %v333_v38 = vmul.f32 %v1178_v10, %v297_v26  ;;  %v334_v39 = vmul.f32 %v1178_v10, %v298_v27  ;;  %v345_v40 = vadd.f32 %v1184_v12, %v309_v28 }
  0x46   : > { %511 = vmatpush.bf16.msra.mxu0 %v719_v22  ;;  %745 = vmatpush.bf16.msra.mxu1 %v719_v22  ;;  %v423_v42 = vadd.f32 %v415_v33, %v399_v24  ;;  %v346_v43 = vadd.f32 %v1184_v12, %v310_v31  ;;  %v353_v44 = vadd.f32 %v1184_v12, %v317_v32 }
  0x47   : > { %746 = vmatpush.bf16.msra.mxu2 %v719_v22  ;;  %747 = vmatpush.bf16.msra.mxu3 %v719_v22  ;;  %v424_v45 = vadd.f32 %v416_v37, %v400_v29  ;;  %v354_v46 = vadd.f32 %v1184_v12, %v318_v34  ;;  %v361_v47 = vadd.f32 %v1184_v12, %v325_v35  ;;  %v377_v48 = vmax.f32 %v345_v40, 0.0 }
  0x48   : > { %v431_v49 = vmul.f32 0.25, %v423_v42  ;;  %v362_v50 = vadd.f32 %v1184_v12, %v326_v36  ;;  %v369_v51 = vadd.f32 %v1184_v12, %v333_v38  ;;  %v370_v52 = vadd.f32 %v1184_v12, %v334_v39 }
  0x49   : > { %v432_v55 = vmul.f32 0.25, %v424_v45  ;;  %v378_v56 = vmax.f32 %v346_v43, 0.0  ;;  %v385_v57 = vmax.f32 %v353_v44, 0.0  ;;  %v386_v58 = vmax.f32 %v354_v46, 0.0 }
  0x4a   : > { %512 = vmatpush.bf16.msra.mxu0 %v718_v41  ;;  %748 = vmatpush.bf16.msra.mxu1 %v718_v41  ;;  %v393_v61 = vmax.f32 %v361_v47, 0.0  ;;  %v394_v62 = vmax.f32 %v362_v50, 0.0  ;;  %v401_v63 = vmax.f32 %v369_v51, 0.0  ;;  %v402_v2 = vmax.f32 %v370_v52, 0.0 }
  0x4b   : > { %749 = vmatpush.bf16.msra.mxu2 %v718_v41  ;;  %750 = vmatpush.bf16.msra.mxu3 %v718_v41  ;;  %v438_v1 = vpack.c.bf16 %v432_v55, %v431_v49  ;;  %v409_v3 = vadd.f32 %v385_v57, %v377_v48  ;;  %v410_v4 = vadd.f32 %v386_v58, %v378_v56 }
  0x4c   : > { %v311_v11 = vmul.f32 %v1178_v10, %v275_v53  ;;  %v312_v13 = vmul.f32 %v1178_v10, %v276_v54  ;;  %v319_v14 = vmul.f32 %v1178_v10, %v283_v59  ;;  %v320_v15 = vmul.f32 %v1178_v10, %v284_v60 }
  0x4d   : > { %513 = vmatmul.bf16.vlgmr.msra.gmra.mxu0 %v437_v23  ;;  %518 = vmatmul.bf16.vlgmr.msra.gmra.mxu1 %v438_v1  ;;  %v417_v16 = vadd.f32 %v409_v3, %v393_v61  ;;  %v418_v17 = vadd.f32 %v410_v4, %v394_v62  ;;  %v327_v18 = vmul.f32 %v1178_v10, %v291_v0 }
  0x4e   : > { %v328_v19 = vmul.f32 %v1178_v10, %v292_v5  ;;  %v335_v20 = vmul.f32 %v1178_v10, %v299_v6  ;;  %v336_v21 = vmul.f32 %v1178_v10, %v300_v7  ;;  %v347_v22 = vadd.f32 %v1184_v12, %v311_v11 }
  0x4f   : > { %v425_v24 = vadd.f32 %v417_v16, %v401_v63  ;;  %v426_v25 = vadd.f32 %v418_v17, %v402_v2  ;;  %v348_v26 = vadd.f32 %v1184_v12, %v312_v13  ;;  %v355_v8 = vadd.f32 %v1184_v12, %v319_v14 }
  0x50   : > { %v356_v9 = vadd.f32 %v1184_v12, %v320_v15  ;;  %v363_v23 = vadd.f32 %v1184_v12, %v327_v18  ;;  %v364_v27 = vadd.f32 %v1184_v12, %v328_v19  ;;  %v371_v28 = vadd.f32 %v1184_v12, %v335_v20 }
  0x51   : > { %v433_v29 = vmul.f32 0.25, %v425_v24  ;;  %v434_v30 = vmul.f32 0.25, %v426_v25  ;;  %v372_v10 = vadd.f32 %v1184_v12, %v336_v21  ;;  %v379_v31 = vmax.f32 %v347_v22, 0.0 }
  0x52   : > { %v380_v32 = vmax.f32 %v348_v26, 0.0  ;;  %v387_v33 = vmax.f32 %v355_v8, 0.0  ;;  %v388_v34 = vmax.f32 %v356_v9, 0.0  ;;  %v395_v35 = vmax.f32 %v363_v23, 0.0 }
  0x53   : > { %v439_v36 = vpack.c.bf16 %v434_v30, %v433_v29  ;;  %v396_v37 = vmax.f32 %v364_v27, 0.0  ;;  %v403_v38 = vmax.f32 %v371_v28, 0.0  ;;  %v404_v39 = vmax.f32 %v372_v10, 0.0 }
  0x54   : > { %v411_v40 = vadd.f32 %v387_v33, %v379_v31  ;;  %v412_v41 = vadd.f32 %v388_v34, %v380_v32 }
  0x55   : > { %523 = vmatmul.bf16.vlgmr.msra.gmra.mxu2 %v439_v36 }
  0x56   : > { %v419_v42 = vadd.f32 %v411_v40, %v395_v35  ;;  %v420_v43 = vadd.f32 %v412_v41, %v396_v37 }
  0x58   : > { %v427_v44 = vadd.f32 %v419_v42, %v403_v38  ;;  %v428_v45 = vadd.f32 %v420_v43, %v404_v39 }
  0x5a   : > { %v435_v46 = vmul.f32 0.25, %v427_v44  ;;  %v436_v12 = vmul.f32 0.25, %v428_v45 }
  0x5c   : > { %v440_v47 = vpack.c.bf16 %v436_v12, %v435_v46 }
  0x5e   : > { %528 = vmatmul.bf16.vlgmr.msra.gmra.mxu3 %v440_v47 }
  0xca   : > { %v514_v48 = vpop.f32.mrf.mxu0  ;;  %v519_v49 = vpop.f32.mrf.mxu1 }
  0xcb   : > { %534 = vst [vmem:[%s266_s26] sm:$0xff] %v514_v48 }
  0xcc   : > { %536 = vst [vmem:[%s266_s26 + $0x10] sm:$0xff] %v519_v49 }
  0xd2   : > { %v516_v50 = vpop.f32.mrf.mxu0  ;;  %v521_v51 = vpop.f32.mrf.mxu1 }
  0xd3   : > { %535 = vst [vmem:[%s266_s26 + $0x8] sm:$0xff] %v516_v50 }
  0xd4   : > { %537 = vst [vmem:[%s266_s26 + $0x18] sm:$0xff] %v521_v51 }
  0xd8   : > { %v524_v52 = vpop.f32.mrf.mxu2 }
  0xd9   : > { %538 = vst [vmem:[%s266_s26 + $0x20] sm:$0xff] %v524_v52 }
  0xe0   : > { %v526_v53 = vpop.f32.mrf.mxu2 }
  0xe1   : > { %v529_v54 = vpop.f32.mrf.mxu3  ;;  %539 = vst [vmem:[%s266_s26 + $0x28] sm:$0xff] %v526_v53 }
  0xe2   : > { %540 = vst [vmem:[%s266_s26 + $0x30] sm:$0xff] %v529_v54 }
  0xe9   : > { %v531_v55 = vpop.f32.mrf.mxu3 }
  0xea   : > { %541 = vst [vmem:[%s266_s26 + $0x38] sm:$0xff] %v531_v55 }
  0xeb   : > { %959 = shalt.err (!%p956_p1)
}
  0xec   : > { %s1026_s23 = smov 128   ;;  %s1027_s1 = smov 8  }
  0xed   : > { %761 = dma.vmem_to_hbm [thread:$0]  (%p1105_p8), %s558_s13, 1024, %s560_s5, %s543_s8, %s1026_s23, %s1026_s23, %s1027_s1  }
  0xee PF: > { %s574_s3 = sand.u32 1, %s998_s15   ;;  %p775_p2 = pnand %p671_p13, %p1109_p9 }
  0xef   : > { %s575_s24 = scalar_lea.sflag [#allocation4], %s574_s3 }
  0xf0   : > { %p776_p4 = pneg %p775_p2 }
  0xf2   : > { %993 = dma.done.wait (%p776_p4), %s575_s24, 1024  }
  0xf3   : > { %995 = vsyncadd (%p776_p4), %s575_s24, 4294966272  ;;  %s21_s20 = sadd.s32 1, %s1018_s20   ;;  %s1339_s15 = smov %s1002_s16 }
  0xf4   : > { %p18_p6 = scmp.ge.s32.totalorder %s21_s20, 4   ;;  %s1340_s16 = smov %s1006_s17 }
  0xf5   : > { %s1341_s17 = smov %s1150_s14  ;;  %s1342_s18 = smov %s1014_s19 }
  0xf6   : > { %s1343_s19 = smov %s1345_s30  ;;  %20 = sbr.rel (!%p18_p6) target bundleno = 10 (0xa), region = 89 }
  0xfb   :  { %581 = vsyncpa [#allocation3], 1 }
  0xfc   :  { %583 = vsyncpa [#allocation3 + $0x1], 1 }
  0xfd   :  { %584 = vsyncpa [#allocation6], 1 }
  0xfe   :  { %585 = vsyncpa [#allocation4], 1 }
  0xff   :  { %587 = vsyncpa [#allocation4 + $0x1], 1 }

</bundles_post_ra>
